<compile_context>
chip_gen: v6e
topology: v6e:2x2x1
jax: 0.10.0
libtpu: 0.0.40
codegen_flags: <defaults>
</compile_context>

<pallas_src>
import functools

import jax
import jax.numpy as jnp
from jax import lax
from jax.experimental import pallas as pl
from jax.experimental.pallas import tpu as pltpu


# ----------------------------------------------------------------------------
# helpers
# ----------------------------------------------------------------------------
def _heads_per_group(num_heads, head_dim):
    """Largest divisor of num_heads whose group lane-width is <= 128.

    With C % 128 == 0 (ViT-B/L/H) and head_dim <= 128 this makes every q/k/v
    group slice start at a 128-aligned lane offset (cheap slices, unmasked
    stores); e.g. Dh=64 -> pairs of heads (group width 128)."""
    if head_dim % 128 == 0:
        return 1
    best = 1
    for hpg in range(1, num_heads + 1):
        if num_heads % hpg == 0 and hpg * head_dim <= 128:
            best = hpg
    return best


# ----------------------------------------------------------------------------
# Fused kernel: qkv projection + multi-head attention + head merge + out proj
# (one grid step per batch element)
# ----------------------------------------------------------------------------
def _fused_vit_attn_kernel(x_ref, wqkv_ref, wproj_ref, bproj_ref, o_ref,
                           qkv_s, ctx_s, *, num_heads, head_dim, scale,
                           heads_per_group):
    C = num_heads * head_dim
    gw = heads_per_group * head_dim

    # 1) QKV projection for this batch element (qkv_bias=False -> no bias add).
    #    f32 MXU accumulation, result stored to VMEM scratch in compute dtype.
    qkv_s[...] = jnp.dot(x_ref[...], wqkv_ref[...],
                         preferred_element_type=jnp.float32).astype(qkv_s.dtype)

    # 2) Per-head softmax attention, processed in lane-aligned head groups.
    num_groups = num_heads // heads_per_group
    for g in range(num_groups):                       # static unroll (small)
        base = g * gw
        q_g = qkv_s[:, base:base + gw]                # (N, gw) aligned slices
        k_g = qkv_s[:, C + base:C + base + gw]
        v_g = qkv_s[:, 2 * C + base:2 * C + base + gw]

        grp_ctx = []
        for j in range(heads_per_group):              # heads within the group
            lo, hi = j * head_dim, (j + 1) * head_dim
            q = q_g[:, lo:hi] * scale                 # (N, Dh)
            k = k_g[:, lo:hi]
            v = v_g[:, lo:hi]

            # q @ k^T contracting on the last dims (no materialized k.T).
            s = lax.dot_general(q, k, (((1,), (1,)), ((), ())),
                                preferred_element_type=jnp.float32)   # (N, N)

            # numerically-stable softmax statistics in f32
            m = jnp.max(s, axis=-1, keepdims=True)
            p = jnp.exp(s - m)
            l = jnp.sum(p, axis=-1, keepdims=True)

            ctx = jnp.dot(p.astype(v.dtype), v,
                          preferred_element_type=jnp.float32)         # (N, Dh)
            # Deferred normalization on the (N, Dh) context; approx reciprocal
            # runs in the EUP slot (effectively free).
            grp_ctx.append(ctx * pl.reciprocal(l, approx=True))

        # Cast + store the group's merged context immediately (128-lane
        # aligned offsets for real ViT shapes -> unmasked stores; bounds the
        # number of live f32 context registers).
        ctx_s[:, base:base + gw] = (
            jnp.concatenate(grp_ctx, axis=-1).astype(ctx_s.dtype))

    # 3) Output projection (nn.Linear(dim, dim) with bias).
    out = jnp.dot(ctx_s[...], wproj_ref[...],
                  preferred_element_type=jnp.float32)
    out = out + bproj_ref[...].astype(jnp.float32)
    o_ref[...] = out.astype(o_ref.dtype)


# ----------------------------------------------------------------------------
# Full forward (matches ViTSelfAttentionWithExtras.forward, default options)
# ----------------------------------------------------------------------------
def vit_self_attention(x, w_qkv, w_proj, b_proj, num_heads):
    """x: (B, N, C); w_qkv: (C, 3C) (= qkv.weight.T); w_proj: (C, C)
    (= proj.weight.T); b_proj: (C,) or (1, C).  Returns (B, N, C)."""
    B, N, C = x.shape
    assert C % num_heads == 0, "dim should be divisible by num_heads"
    head_dim = C // num_heads
    scale = head_dim ** (-0.5)
    assert w_qkv.shape == (C, 3 * C), w_qkv.shape
    assert w_proj.shape == (C, C), w_proj.shape
    b_proj = jnp.asarray(b_proj).reshape(1, C)        # accept (C,) or (1, C)

    hpg = _heads_per_group(num_heads, head_dim)
    compute_dtype = x.dtype

    kern = functools.partial(_fused_vit_attn_kernel, num_heads=num_heads,
                             head_dim=head_dim, scale=scale,
                             heads_per_group=hpg)

    itemsize = jnp.dtype(x.dtype).itemsize
    # VMEM working-set estimate: double-buffered operands/output + scratch +
    # f32 temporaries.  Only raise the scoped limit when actually needed.
    est = 2 * (N * C + C * 3 * C + C * C + C + N * C) * itemsize
    est += (N * 3 * C + N * C) * itemsize             # qkv / ctx scratch
    est += (N * 3 * C + 2 * N * N + N * C) * 4        # f32 matmul/softmax temps
    vmem_limit = None
    if est > 30 * 2 ** 20:
        # TODO(synk): v7x has only 64 MiB physical VMEM; for very large C / N
        # tile the weights or switch to flash-style q-row tiling instead.
        vmem_limit = min(int(est * 1.25), 64 * 2 ** 20)

    cost = pl.CostEstimate(
        flops=(2 * B * N * C * 3 * C                   # qkv projection
               + 4 * B * num_heads * N * N * head_dim  # qk^T + pv
               + 2 * B * N * C * C),                   # output projection
        transcendentals=B * num_heads * N * N,
        bytes_accessed=(2 * B * N * C + C * 3 * C + C * C + C) * itemsize)

    return pl.pallas_call(
        kern,
        out_shape=jax.ShapeDtypeStruct((B, N, C), x.dtype),
        grid=(B,),
        in_specs=[
            pl.BlockSpec((None, N, C), lambda b: (b, 0, 0)),   # x (per batch)
            pl.BlockSpec((C, 3 * C), lambda b: (0, 0)),        # w_qkv resident
            pl.BlockSpec((C, C), lambda b: (0, 0)),            # w_proj resident
            pl.BlockSpec((1, C), lambda b: (0, 0)),            # b_proj resident
        ],
        out_specs=pl.BlockSpec((None, N, C), lambda b: (b, 0, 0)),
        scratch_shapes=[
            pltpu.VMEM((N, 3 * C), compute_dtype),   # qkv for this batch elem
            pltpu.VMEM((N, C), compute_dtype),       # merged-heads context
        ],
        compiler_params=pltpu.CompilerParams(
            dimension_semantics=("parallel",),       # batch axis -> megacore
            vmem_limit_bytes=vmem_limit),
        cost_estimate=cost,
    )(x, w_qkv, w_proj, b_proj)


# ----------------------------------------------------------------------------
# Pure-JAX reference (for correctness checks)
# ----------------------------------------------------------------------------
def vit_self_attention_ref(x, w_qkv, w_proj, b_proj, num_heads):
    B, N, C = x.shape
    H = num_heads
    Dh = C // H
    scale = Dh ** (-0.5)
    qkv = (x @ w_qkv).reshape(B, N, 3, H, Dh).transpose(2, 0, 3, 1, 4)
    q, k, v = qkv[0], qkv[1], qkv[2]
    attn = jax.nn.softmax((q * scale) @ jnp.swapaxes(k, -1, -2), axis=-1)
    ctx = (attn @ v).transpose(0, 2, 1, 3).reshape(B, N, C)
    return ctx @ w_proj + jnp.asarray(b_proj).reshape(1, C)


if __name__ == "__main__":
    def _check(B, N, C, H, atol, rtol, seed=0, dtype=jnp.float32):
        key = jax.random.PRNGKey(seed)
        kx, kqkv, kproj, kbp = jax.random.split(key, 4)
        x = jax.random.normal(kx, (B, N, C), dtype=dtype)
        # Synthetic parameters (shapes from __init__), pre-transposed for x@W:
        #   qkv:  Linear(dim, 3*dim, bias=False) -> weight.T shape (C, 3C)
        #   proj: Linear(dim, dim)               -> weight.T (C, C), bias (C,)
        w_qkv = jax.random.normal(kqkv, (C, 3 * C), dtype=dtype) * (C ** -0.5)
        w_proj = jax.random.normal(kproj, (C, C), dtype=dtype) * (C ** -0.5)
        b_proj = jax.random.normal(kbp, (C,), dtype=dtype) * 0.02

        out = vit_self_attention(x, w_qkv, w_proj, b_proj, num_heads=H)
        out = jax.block_until_ready(out)
        ref = vit_self_attention_ref(x, w_qkv, w_proj, b_proj, num_heads=H)
        assert out.shape == (B, N, C), out.shape
        # tolerance accounts for approx reciprocal (EUP) + f32 MXU accumulation
        assert jnp.allclose(out, ref, atol=atol, rtol=rtol), (
            (B, N, C, H), float(jnp.max(jnp.abs(out - ref))))

    # Small shapes consistent with the module: B=2, seq N=8, hidden C=32, H=4.
    _check(B=2, N=8, C=32, H=4, atol=5e-3, rtol=5e-3, seed=0)

    # Mid-size check exercising the real ViT code paths: Dh=64 -> 128-lane
    # head pairs, sequence length not a multiple of 8.
    _check(B=2, N=197, C=256, H=4, atol=1e-2, rtol=1e-2, seed=1)

    print("KERNEL_OK")
</pallas_src>

<mosaic_0001>
module attributes {stable_mosaic.version = 11 : i64} {
  func.func @_fused_vit_attn_kernel(%arg0: i32, %arg1: memref<1x8x32xf32, #tpu.memory_space<vmem>>, %arg2: memref<32x96xf32, #tpu.memory_space<vmem>>, %arg3: memref<32x32xf32, #tpu.memory_space<vmem>>, %arg4: memref<1x32xf32, #tpu.memory_space<vmem>>, %arg5: memref<1x8x32xf32, #tpu.memory_space<vmem>>, %arg6: memref<8x96xf32, #tpu.memory_space<vmem>>, %arg7: memref<8x32xf32, #tpu.memory_space<vmem>>) attributes {dimension_semantics = [#tpu.dimension_semantics<parallel>], iteration_bounds = array<i64: 2>, scalar_prefetch = 0 : i64, scratch_operands = 2 : i64, tpu.core_type = #tpu.core_type<tc>, window_params = [{transform_indices = @transform_0, window_bounds = array<i64: 1, 8, 32>}, {pipeline_mode = #tpu.pipeline_mode<synchronous>, transform_indices = @transform_1, window_bounds = array<i64: 32, 96>}, {pipeline_mode = #tpu.pipeline_mode<synchronous>, transform_indices = @transform_2, window_bounds = array<i64: 32, 32>}, {pipeline_mode = #tpu.pipeline_mode<synchronous>, transform_indices = @transform_3, window_bounds = array<i64: 1, 32>}, {transform_indices = @transform_4, window_bounds = array<i64: 1, 8, 32>}]} {
    %c0 = arith.constant 0 : index
    %c0_0 = arith.constant 0 : index
    %c0_1 = arith.constant 0 : index
    %0 = vector.load %arg1[%c0, %c0_0, %c0_1] : memref<1x8x32xf32, #tpu.memory_space<vmem>>, vector<1x8x32xf32>
    %1 = vector.shape_cast %0 : vector<1x8x32xf32> to vector<8x32xf32>
    %c0_2 = arith.constant 0 : index
    %c0_3 = arith.constant 0 : index
    %2 = vector.load %arg2[%c0_2, %c0_3] : memref<32x96xf32, #tpu.memory_space<vmem>>, vector<32x96xf32>
    %cst = arith.constant dense<0.000000e+00> : vector<8x96xf32>
    %3 = tpu.matmul %1, %2, %cst {dimension_numbers = #tpu.dot_dimension_numbers<[1], [0], [0], [1], [0, 0, 1, 1], [], []>} : vector<8x32xf32>, vector<32x96xf32>, vector<8x96xf32> -> vector<8x96xf32>
    %c0_4 = arith.constant 0 : index
    %c0_5 = arith.constant 0 : index
    %4 = vector.load %arg6[%c0_4, %c0_5] : memref<8x96xf32, #tpu.memory_space<vmem>>, vector<8x96xf32>
    tpu.vector_store %arg6[%c0_4, %c0_5], %3 {strides = array<i32>} : memref<8x96xf32, #tpu.memory_space<vmem>>, vector<8x96xf32>,
    %c0_6 = arith.constant 0 : index
    %c0_7 = arith.constant 0 : index
    %5 = vector.load %arg6[%c0_6, %c0_7] : memref<8x96xf32, #tpu.memory_space<vmem>>, vector<8x32xf32>
    %c0_8 = arith.constant 0 : index
    %c32 = arith.constant 32 : index
    %6 = vector.load %arg6[%c0_8, %c32] : memref<8x96xf32, #tpu.memory_space<vmem>>, vector<8x32xf32>
    %c0_9 = arith.constant 0 : index
    %c64 = arith.constant 64 : index
    %7 = vector.load %arg6[%c0_9, %c64] : memref<8x96xf32, #tpu.memory_space<vmem>>, vector<8x32xf32>
    %8 = vector.extract_strided_slice %5 {offsets = [0, 0], sizes = [8, 8], strides = [1, 1]} : vector<8x32xf32> to vector<8x8xf32>
    %cst_10 = arith.constant 0.353553385 : f32
    %9 = vector.broadcast %cst_10 : f32 to vector<8x8xf32>
    %10 = arith.mulf %8, %9 : vector<8x8xf32>
    %11 = vector.extract_strided_slice %6 {offsets = [0, 0], sizes = [8, 8], strides = [1, 1]} : vector<8x32xf32> to vector<8x8xf32>
    %12 = vector.extract_strided_slice %7 {offsets = [0, 0], sizes = [8, 8], strides = [1, 1]} : vector<8x32xf32> to vector<8x8xf32>
    %cst_11 = arith.constant dense<0.000000e+00> : vector<8x8xf32>
    %13 = tpu.matmul %10, %11, %cst_11 {dimension_numbers = #tpu.dot_dimension_numbers<[1], [1], [0], [0], [0, 0, 1, 0], [], []>} : vector<8x8xf32>, vector<8x8xf32>, vector<8x8xf32> -> vector<8x8xf32>
    %cst_12 = arith.constant dense<0xFF800000> : vector<8xf32>
    %14 = vector.multi_reduction <maximumf>, %13, %cst_12 [1] : vector<8x8xf32> to vector<8xf32>
    %15 = vector.shape_cast %14 : vector<8xf32> to vector<8x1xf32>
    %16 = vector.broadcast %15 : vector<8x1xf32> to vector<8x8xf32>
    %17 = arith.subf %13, %16 : vector<8x8xf32>
    %18 = math.exp %17 : vector<8x8xf32>
    %cst_13 = arith.constant dense<0.000000e+00> : vector<8xf32>
    %19 = vector.multi_reduction <add>, %18, %cst_13 [1] : vector<8x8xf32> to vector<8xf32>
    %20 = vector.shape_cast %19 : vector<8xf32> to vector<8x1xf32>
    %cst_14 = arith.constant dense<0.000000e+00> : vector<8x8xf32>
    %21 = tpu.matmul %18, %12, %cst_14 {dimension_numbers = #tpu.dot_dimension_numbers<[1], [0], [0], [1], [0, 0, 1, 1], [], []>} : vector<8x8xf32>, vector<8x8xf32>, vector<8x8xf32> -> vector<8x8xf32>
    %22 = tpu.reciprocal %20 {approx = true} : vector<8x1xf32> -> vector<8x1xf32>
    %23 = vector.broadcast %22 : vector<8x1xf32> to vector<8x8xf32>
    %24 = arith.mulf %21, %23 : vector<8x8xf32>
    %25 = vector.extract_strided_slice %5 {offsets = [0, 8], sizes = [8, 8], strides = [1, 1]} : vector<8x32xf32> to vector<8x8xf32>
    %cst_15 = arith.constant 0.353553385 : f32
    %26 = vector.broadcast %cst_15 : f32 to vector<8x8xf32>
    %27 = arith.mulf %25, %26 : vector<8x8xf32>
    %28 = vector.extract_strided_slice %6 {offsets = [0, 8], sizes = [8, 8], strides = [1, 1]} : vector<8x32xf32> to vector<8x8xf32>
    %29 = vector.extract_strided_slice %7 {offsets = [0, 8], sizes = [8, 8], strides = [1, 1]} : vector<8x32xf32> to vector<8x8xf32>
    %cst_16 = arith.constant dense<0.000000e+00> : vector<8x8xf32>
    %30 = tpu.matmul %27, %28, %cst_16 {dimension_numbers = #tpu.dot_dimension_numbers<[1], [1], [0], [0], [0, 0, 1, 0], [], []>} : vector<8x8xf32>, vector<8x8xf32>, vector<8x8xf32> -> vector<8x8xf32>
    %cst_17 = arith.constant dense<0xFF800000> : vector<8xf32>
    %31 = vector.multi_reduction <maximumf>, %30, %cst_17 [1] : vector<8x8xf32> to vector<8xf32>
    %32 = vector.shape_cast %31 : vector<8xf32> to vector<8x1xf32>
    %33 = vector.broadcast %32 : vector<8x1xf32> to vector<8x8xf32>
    %34 = arith.subf %30, %33 : vector<8x8xf32>
    %35 = math.exp %34 : vector<8x8xf32>
    %cst_18 = arith.constant dense<0.000000e+00> : vector<8xf32>
    %36 = vector.multi_reduction <add>, %35, %cst_18 [1] : vector<8x8xf32> to vector<8xf32>
    %37 = vector.shape_cast %36 : vector<8xf32> to vector<8x1xf32>
    %cst_19 = arith.constant dense<0.000000e+00> : vector<8x8xf32>
    %38 = tpu.matmul %35, %29, %cst_19 {dimension_numbers = #tpu.dot_dimension_numbers<[1], [0], [0], [1], [0, 0, 1, 1], [], []>} : vector<8x8xf32>, vector<8x8xf32>, vector<8x8xf32> -> vector<8x8xf32>
    %39 = tpu.reciprocal %37 {approx = true} : vector<8x1xf32> -> vector<8x1xf32>
    %40 = vector.broadcast %39 : vector<8x1xf32> to vector<8x8xf32>
    %41 = arith.mulf %38, %40 : vector<8x8xf32>
    %42 = vector.extract_strided_slice %5 {offsets = [0, 16], sizes = [8, 8], strides = [1, 1]} : vector<8x32xf32> to vector<8x8xf32>
    %cst_20 = arith.constant 0.353553385 : f32
    %43 = vector.broadcast %cst_20 : f32 to vector<8x8xf32>
    %44 = arith.mulf %42, %43 : vector<8x8xf32>
    %45 = vector.extract_strided_slice %6 {offsets = [0, 16], sizes = [8, 8], strides = [1, 1]} : vector<8x32xf32> to vector<8x8xf32>
    %46 = vector.extract_strided_slice %7 {offsets = [0, 16], sizes = [8, 8], strides = [1, 1]} : vector<8x32xf32> to vector<8x8xf32>
    %cst_21 = arith.constant dense<0.000000e+00> : vector<8x8xf32>
    %47 = tpu.matmul %44, %45, %cst_21 {dimension_numbers = #tpu.dot_dimension_numbers<[1], [1], [0], [0], [0, 0, 1, 0], [], []>} : vector<8x8xf32>, vector<8x8xf32>, vector<8x8xf32> -> vector<8x8xf32>
    %cst_22 = arith.constant dense<0xFF800000> : vector<8xf32>
    %48 = vector.multi_reduction <maximumf>, %47, %cst_22 [1] : vector<8x8xf32> to vector<8xf32>
    %49 = vector.shape_cast %48 : vector<8xf32> to vector<8x1xf32>
    %50 = vector.broadcast %49 : vector<8x1xf32> to vector<8x8xf32>
    %51 = arith.subf %47, %50 : vector<8x8xf32>
    %52 = math.exp %51 : vector<8x8xf32>
    %cst_23 = arith.constant dense<0.000000e+00> : vector<8xf32>
    %53 = vector.multi_reduction <add>, %52, %cst_23 [1] : vector<8x8xf32> to vector<8xf32>
    %54 = vector.shape_cast %53 : vector<8xf32> to vector<8x1xf32>
    %cst_24 = arith.constant dense<0.000000e+00> : vector<8x8xf32>
    %55 = tpu.matmul %52, %46, %cst_24 {dimension_numbers = #tpu.dot_dimension_numbers<[1], [0], [0], [1], [0, 0, 1, 1], [], []>} : vector<8x8xf32>, vector<8x8xf32>, vector<8x8xf32> -> vector<8x8xf32>
    %56 = tpu.reciprocal %54 {approx = true} : vector<8x1xf32> -> vector<8x1xf32>
    %57 = vector.broadcast %56 : vector<8x1xf32> to vector<8x8xf32>
    %58 = arith.mulf %55, %57 : vector<8x8xf32>
    %59 = vector.extract_strided_slice %5 {offsets = [0, 24], sizes = [8, 8], strides = [1, 1]} : vector<8x32xf32> to vector<8x8xf32>
    %cst_25 = arith.constant 0.353553385 : f32
    %60 = vector.broadcast %cst_25 : f32 to vector<8x8xf32>
    %61 = arith.mulf %59, %60 : vector<8x8xf32>
    %62 = vector.extract_strided_slice %6 {offsets = [0, 24], sizes = [8, 8], strides = [1, 1]} : vector<8x32xf32> to vector<8x8xf32>
    %63 = vector.extract_strided_slice %7 {offsets = [0, 24], sizes = [8, 8], strides = [1, 1]} : vector<8x32xf32> to vector<8x8xf32>
    %cst_26 = arith.constant dense<0.000000e+00> : vector<8x8xf32>
    %64 = tpu.matmul %61, %62, %cst_26 {dimension_numbers = #tpu.dot_dimension_numbers<[1], [1], [0], [0], [0, 0, 1, 0], [], []>} : vector<8x8xf32>, vector<8x8xf32>, vector<8x8xf32> -> vector<8x8xf32>
    %cst_27 = arith.constant dense<0xFF800000> : vector<8xf32>
    %65 = vector.multi_reduction <maximumf>, %64, %cst_27 [1] : vector<8x8xf32> to vector<8xf32>
    %66 = vector.shape_cast %65 : vector<8xf32> to vector<8x1xf32>
    %67 = vector.broadcast %66 : vector<8x1xf32> to vector<8x8xf32>
    %68 = arith.subf %64, %67 : vector<8x8xf32>
    %69 = math.exp %68 : vector<8x8xf32>
    %cst_28 = arith.constant dense<0.000000e+00> : vector<8xf32>
    %70 = vector.multi_reduction <add>, %69, %cst_28 [1] : vector<8x8xf32> to vector<8xf32>
    %71 = vector.shape_cast %70 : vector<8xf32> to vector<8x1xf32>
    %cst_29 = arith.constant dense<0.000000e+00> : vector<8x8xf32>
    %72 = tpu.matmul %69, %63, %cst_29 {dimension_numbers = #tpu.dot_dimension_numbers<[1], [0], [0], [1], [0, 0, 1, 1], [], []>} : vector<8x8xf32>, vector<8x8xf32>, vector<8x8xf32> -> vector<8x8xf32>
    %73 = tpu.reciprocal %71 {approx = true} : vector<8x1xf32> -> vector<8x1xf32>
    %74 = vector.broadcast %73 : vector<8x1xf32> to vector<8x8xf32>
    %75 = arith.mulf %72, %74 : vector<8x8xf32>
    %76 = tpu.concatenate %24, %41, %58, %75 in 1 : vector<8x8xf32>, vector<8x8xf32>, vector<8x8xf32>, vector<8x8xf32> -> vector<8x32xf32>
    %c0_30 = arith.constant 0 : index
    %c0_31 = arith.constant 0 : index
    %77 = vector.load %arg7[%c0_30, %c0_31] : memref<8x32xf32, #tpu.memory_space<vmem>>, vector<8x32xf32>
    tpu.vector_store %arg7[%c0_30, %c0_31], %76 {strides = array<i32>} : memref<8x32xf32, #tpu.memory_space<vmem>>, vector<8x32xf32>,
    %c0_32 = arith.constant 0 : index
    %c0_33 = arith.constant 0 : index
    %78 = vector.load %arg7[%c0_32, %c0_33] : memref<8x32xf32, #tpu.memory_space<vmem>>, vector<8x32xf32>
    %c0_34 = arith.constant 0 : index
    %c0_35 = arith.constant 0 : index
    %79 = vector.load %arg3[%c0_34, %c0_35] : memref<32x32xf32, #tpu.memory_space<vmem>>, vector<32x32xf32>
    %cst_36 = arith.constant dense<0.000000e+00> : vector<8x32xf32>
    %80 = tpu.matmul %78, %79, %cst_36 {dimension_numbers = #tpu.dot_dimension_numbers<[1], [0], [0], [1], [0, 0, 1, 1], [], []>} : vector<8x32xf32>, vector<32x32xf32>, vector<8x32xf32> -> vector<8x32xf32>
    %c0_37 = arith.constant 0 : index
    %c0_38 = arith.constant 0 : index
    %81 = vector.load %arg4[%c0_37, %c0_38] : memref<1x32xf32, #tpu.memory_space<vmem>>, vector<1x32xf32>
    %82 = vector.broadcast %81 : vector<1x32xf32> to vector<8x32xf32>
    %83 = arith.addf %80, %82 : vector<8x32xf32>
    %c0_39 = arith.constant 0 : index
    %c0_40 = arith.constant 0 : index
    %c0_41 = arith.constant 0 : index
    %84 = vector.load %arg5[%c0_39, %c0_40, %c0_41] : memref<1x8x32xf32, #tpu.memory_space<vmem>>, vector<1x8x32xf32>
    %85 = vector.shape_cast %84 : vector<1x8x32xf32> to vector<8x32xf32>
    %86 = vector.shape_cast %83 : vector<8x32xf32> to vector<1x8x32xf32>
    tpu.vector_store %arg5[%c0_39, %c0_40, %c0_41], %86 {strides = array<i32>} : memref<1x8x32xf32, #tpu.memory_space<vmem>>, vector<1x8x32xf32>,
    return
  }
  func.func @transform_0(%arg0: i32) -> (i32, i32, i32) {
    %c0_i32 = arith.constant 0 : i32
    %c0_i32_0 = arith.constant 0 : i32
    %c0_i32_1 = arith.constant 0 : i32
    return %arg0, %c0_i32, %c0_i32_0 : i32, i32, i32
  }
  func.func @transform_1(%arg0: i32) -> (i32, i32) {
    %c0_i32 = arith.constant 0 : i32
    %c0_i32_0 = arith.constant 0 : i32
    %c0_i32_1 = arith.constant 0 : i32
    return %c0_i32, %c0_i32_0 : i32, i32
  }
  func.func @transform_2(%arg0: i32) -> (i32, i32) {
    %c0_i32 = arith.constant 0 : i32
    %c0_i32_0 = arith.constant 0 : i32
    %c0_i32_1 = arith.constant 0 : i32
    return %c0_i32, %c0_i32_0 : i32, i32
  }
  func.func @transform_3(%arg0: i32) -> (i32, i32) {
    %c0_i32 = arith.constant 0 : i32
    %c0_i32_0 = arith.constant 0 : i32
    %c0_i32_1 = arith.constant 0 : i32
    return %c0_i32, %c0_i32_0 : i32, i32
  }
  func.func @transform_4(%arg0: i32) -> (i32, i32, i32) {
    %c0_i32 = arith.constant 0 : i32
    %c0_i32_0 = arith.constant 0 : i32
    %c0_i32_1 = arith.constant 0 : i32
    return %arg0, %c0_i32, %c0_i32_0 : i32, i32, i32
  }
}

</mosaic_0001>

<bundles_post_ra>
// kernel: tpu_custom_call.1
= control target key start
LH: loop header
LB: loop body
LE: loop exit
PB: predicated region body
PF: predicated region fallthrough
CT: control target
= control target key end

     0   :  { %9 = vsyncpa [#allocation5], 0  ;;  %s1863_s0 = inlined_call_operand.hbm [shape: f32[2,8,32], index: 0, kind: input, shape index: {}]   ;;  %s1864_s1 = inlined_call_operand.hbm [shape: f32[32,96], index: 1, kind: input, shape index: {}]   ;;  %s1865_s2 = inlined_call_operand.hbm [shape: f32[32,32], index: 2, kind: input, shape index: {}]   ;;  %s1866_s3 = inlined_call_operand.vmem [shape: f32[1,32], index: 3, kind: input, shape index: {}]   ;;  %s1867_s4 = inlined_call_operand.hbm [shape: f32[2,8,32], index: 4, kind: output, shape index: {}]  }
   0x1   :  { %11 = vsyncpa [#allocation5 + $0x1], 0 }
   0x2   :  { %12 = vsyncpa [#allocation8], 0 }
   0x3   :  { %13 = vsyncpa [#allocation6], 0 }
   0x4   :  { %15 = vsyncpa [#allocation6 + $0x1], 0  ;;  %s1610_s15 = smov 0   ;;  %s1612_s16 = smov 0  }
   0x5   :  { %s1614_s17 = smov 0   ;;  %s1616_s18 = smov 0  }
   0x6 LB: > { %s1631_s19 = sadd.s32 4294967295, %s1561_s18   ;;  %s1193_s20 = sadd.s32 4294967294, %s1561_s18   ;;  %s1561_s18 = sphi %s1616_s18, %s1889_s18   ;;  %s1557_s17 = sphi %s1614_s17, %s1888_s17   ;;  %s1553_s16 = sphi %s1612_s16, %s1887_s16   ;;  %s1549_s15 = sphi %s1610_s15, %s1886_s15  }
   0x7   : > { %p41_p0 = scmp.ne.s32.totalorder %s1553_s16, %s1549_s15  ;;  %p1868_p1 = scmp.eq.s32.totalorder %s1631_s19, 0 }
   0x8   : > { %p134_p3 = scmp.eq.s32.totalorder %s1193_s20, 1  ;;  %p1194_p5 = scmp.ge.s32.totalorder %s1561_s18, 1 }
   0x9   : > { %p1640_p4 = por %p1868_p1, %p41_p0  ;;  %p141_p7 = scmp.lt.s32.totalorder %s1561_s18, 3 }
   0xa   : > { %p1645_p6 = por %p134_p3, %p41_p0  ;;  %s1563_s24 = smov [#allocation7]  }
   0xb   : > { %s1872_s21 = scalar_select %p1640_p4, 1, 0 }
   0xc   : > { %s1873_s22 = scalar_select %p1645_p6, 1, 0 }
   0xd   : > { %p1650_p8 = pnand %p1194_p5, %p141_p7  ;;  %s153_s25 = sshll.u32 %s1563_s24, 4  ;;  %s154_s25 = int_to_ptr.vmem [resolvable:$true] %s153_s25 }
   0xe   : > { %s1564_s27 = smov [#allocation9]   ;;  %s1424_s29 = scalar_lea.vmem %s154_s25, 512 }
   0xf   : > { %s1874_s23 = scalar_select %p1650_p8, 1, 0 }
  0x10   : > { %p1324_p9 = pneg %p1650_p8  ;;  %s166_s28 = sshll.u32 %s1564_s27, 4  ;;  %s167_s28 = int_to_ptr.vmem [resolvable:$true] %s166_s28 }
  0x11   : > { %p1425_p13 = scmp.ne.s32.totalorder %s154_s25, %s1424_s29  ;;  %p1432_p5 = scmp.lt.s32.totalorder %s154_s25, %s154_s25 }
  0x12   : > { %p1659_p11 = pnand %p1324_p9, %p1868_p1  ;;  %p1433_p7 = scmp.lt.s32.totalorder %s1424_s29, %s1424_s29 }
  0x14   : > { %p1415_p12 = pneg %p1659_p11  ;;  %p1434_p10 = por %p1433_p7, %p1432_p5 }
  0x16   : > { %p1427_p0 = pnand %p1425_p13, %p1415_p12 }
  0x18   : > { %p1428_p3 = pneg %p1427_p0 }
  0x1a   : > { %p1435_p9 = pnand %p1434_p10, %p1428_p3 }
  0x1c   : > { %1438 = shalt.err (!%p1435_p9)
}
  0x1d   : > { %s1565_s30 = smov 128   ;;  %s1566_s5 = smov 8  }
  0x1e   : > { %1327 = dma.hbm_to_vmem [thread:$0]  (!%p1659_p11), %s1864_s1, 512, %s154_s25, [#allocation8], %s1565_s30, %s1565_s30, %s1566_s5  }
  0x1f   : > { %s1450_s8 = scalar_lea.vmem %s167_s28, 512  ;;  %p1458_p2 = scmp.lt.s32.totalorder %s167_s28, %s167_s28 }
  0x20   : > { %p1451_p1 = scmp.ne.s32.totalorder %s167_s28, %s1450_s8  ;;  %p1459_p6 = scmp.lt.s32.totalorder %s1450_s8, %s1450_s8 }
  0x22   : > { %p1453_p13 = pnand %p1451_p1, %p1415_p12  ;;  %p1460_p5 = por %p1459_p6, %p1458_p2 }
  0x24   : > { %p1454_p0 = pneg %p1453_p13 }
  0x26   : > { %p1461_p10 = pnand %p1460_p5, %p1454_p0 }
  0x28   : > { %1464 = shalt.err (!%p1461_p10)
}
  0x29   : > { %1330 = dma.hbm_to_vmem [thread:$0]  (!%p1659_p11), %s1865_s2, 512, %s167_s28, [#allocation8], %s1565_s30, %s1565_s30, %s1566_s5  }
  0x2a   : > { %s1682_s11 = sadd.s32 1, %s1561_s18   ;;  %s28_s12 = sadd.s32 1, %s1557_s17 }
  0x2b   : > { %s25_s13 = ssub.s32 %s1561_s18, %s1682_s11  ;;  %p35_p1 = scmp.ne.s32.totalorder %s1557_s17, %s1553_s16 }
  0x2c   : > { %p26_p2 = scmp.eq.s32.totalorder %s25_s13, 0  ;;  %p36_p6 = scmp.eq.s32.totalorder %s1561_s18, 0 }
  0x2d   : > { %p1876_p12 = scmp.eq.s32.totalorder %s1631_s19, 1  ;;  %p1341_p7 = scmp.lt.s32.totalorder %s1561_s18, 2 }
  0x2e   : > { %s1698_s20 = scalar_select %p26_p2, %s1557_s17, %s28_s12  }
  0x2f   : > { %p1692_p3 = por %p1876_p12, %p35_p1  ;;  %p37_p9 = por %p36_p6, %p35_p1 }
  0x30   : > { %s183_s24 = sand.u32 1, %s1557_s17   ;;  %s1199_s26 = sshll.u32 %s1561_s18, 7 }
  0x31   : > { %s1877_s14 = scalar_select %p1692_p3, 1, 0 }
  0x32   : > { %s1198_s25 = sshll.u32 %s183_s24, 3  ;;  %s1705_s29 = scalar_lea.hbm %s1863_s0, %s1199_s26 }
  0x33   : > { %s187_s30 = scalar_lea.vmem [#allocation4], %s1198_s25  ;;  %p1707_p11 = pnand %p1341_p7, %p37_p9 }
  0x34   : > { %s194_s5 = sshll.u32 %s187_s30, 4  ;;  %s184_s7 = scalar_lea.sflag [#allocation5], %s183_s24  ;;  %s195_s5 = int_to_ptr.vmem [resolvable:$true] %s194_s5 }
  0x35   : > { %s1465_s8 = scalar_lea.hbm %s1705_s29, 128  ;;  %p1467_p0 = pneg %p1707_p11 }
  0x36   : > { %p1466_p13 = scmp.ne.s32.totalorder %s1705_s29, %s1465_s8  ;;  %s1470_s12 = scalar_lea.hbm %s1863_s0, 256 }
  0x37   : > { %p1471_p1 = scmp.lt.s32.totalorder %s1705_s29, %s1863_s0  ;;  %p1472_p2 = scmp.lt.s32.totalorder %s1470_s12, %s1465_s8 }
  0x38   : > { %p1468_p5 = pnand %p1467_p0, %p1466_p13 }
  0x39   : > { %p1473_p6 = por %p1472_p2, %p1471_p1 }
  0x3a   : > { %p1469_p10 = pneg %p1468_p5 }
  0x3c   : > { %p1474_p12 = pnand %p1473_p6, %p1469_p10 }
  0x3e   : > { %1477 = shalt.err (!%p1474_p12)
}
  0x3f   : > { %s1478_s26 = scalar_lea.vmem %s195_s5, 128  ;;  %s1567_s24 = smov [#allocation4]  }
  0x40   : > { %p1479_p7 = scmp.ne.s32.totalorder %s195_s5, %s1478_s26  ;;  %s1483_s27 = sshll.u32 %s1567_s24, 4  ;;  %s1484_s27 = int_to_ptr.vmem [resolvable:$false] %s1483_s27 }
  0x41   : > { %s1485_s28 = scalar_lea.vmem %s1484_s27, 256  ;;  %p1486_p13 = scmp.lt.s32.totalorder %s195_s5, %s1484_s27 }
  0x42   : > { %p1481_p9 = pnand %p1479_p7, %p1467_p0  ;;  %p1487_p5 = scmp.lt.s32.totalorder %s1485_s28, %s1478_s26 }
  0x44   : > { %p1482_p3 = pneg %p1481_p9  ;;  %p1488_p4 = por %p1487_p5, %p1486_p13 }
  0x46   : > { %p1489_p8 = pnand %p1488_p4, %p1482_p3 }
  0x48   : > { %1492 = shalt.err (!%p1489_p8)
}
  0x49   : > { %1334 = dma.hbm_to_vmem [thread:$0]  (!%p1707_p11), %s1705_s29, 128, %s195_s5, %s184_s7  }
  0x4a   : > { %p1879_p10 = scmp.ne.s32.totalorder %s1874_s23, 0 }
  0x4b   : > { %s1728_s30 = sand.u32 (!%p1879_p10), 1, %s1553_s16   ;;  %p1880_p4 = scmp.ne.s32.totalorder (!%p1879_p10), %s1872_s21, 0 }
  0x4c   : > { %203 = sbr.rel (%p1879_p10) target bundleno = 1653 (0x675), region = 36  ;;  %s1201_s8 = sshll.u32 (!%p1879_p10), %s1728_s30, 3 }
  0x4d   : > { %s206_s9 = scalar_lea.sflag (!%p1879_p10), [#allocation5], %s1728_s30  ;;  %s209_s10 = scalar_lea.vmem (!%p1879_p10), [#allocation4], %s1201_s8 }
  0x51   : > { %1536 = dma.done.wait (%p1880_p4), %s206_s9, 128  }
  0x52   : > { %1538 = vsyncadd (%p1880_p4), %s206_s9, 4294967168  ;;  %p1881_p8 = scmp.eq.s32.totalorder %s1631_s19, 0 }
  0x54   : > { %1540 = dma.done.wait (%p1881_p8), [#allocation8], 1024   ;;  %p1882_p3 = pmov %p1881_p8 }
  0x55   : > { %v1568_v0 = vmov 0.0   ;;  %vm1569_vm0 = vmmov 0   ;;  %v246_v1 = vld [vmem:[#allocation7 + $0x18] sm:$0xff]  ;;  %v245_v2 = vld [vmem:[#allocation7 + $0x10] sm:$0xff]  ;;  %v244_v3 = vld [vmem:[#allocation7 + $0x8] sm:$0xff]  ;;  %vm247_vm1 = vcmask 261120  }
  0x56   : > { %1542 = vsyncadd (%p1882_p3), [#allocation8], 4294966272  ;;  %1250 = vmatprep.subr.mxu0 %v1568_v0  ;;  %1258 = vmatprep.mubr.msk.f32.mxu0 %vm1569_vm0, %v1568_v0  ;;  %v243_v4 = vld [vmem:[#allocation7] sm:$0xff]  ;;  %v242_v5 = vld [vmem:[%s209_s10] sm:$0xff]  ;;  %vm321_vm2 = vcmask 785408   ;;  %s1570_s21 = smov 64  }
  0x57   : > { %1261 = vmatprep.subr.mxu1 %v1568_v0  ;;  %1263 = vmatprep.mubr.msk.f32.mxu1 %vm1569_vm0, %v1568_v0  ;;  %s1571_s23 = smov 96   ;;  %s1572_s29 = smov 88   ;;  %vm328_vm3 = vcmask 64512   ;;  %v1008_v58 = vld [vmem:[#allocation9 + $0x18] sm:$0xff]  ;;  %v1007_v59 = vld [vmem:[#allocation9 + $0x10] sm:$0xff]  ;;  %v1006_v63 = vld [vmem:[#allocation9 + $0x8] sm:$0xff] }
  0x58   : > { %1251 = vmatpush3.msra.mxu0 %v246_v1  ;;  %s1573_s5 = smov 120   ;;  %s1574_s6 = smov 80   ;;  %vm999_vm4 = vcmask 130048   ;;  %vm1001_vm5 = vcmask 195584  }
  0x59   : > { %1252 = vmatprep.subr.mxu0 %v1568_v0  ;;  %s1575_s7 = smov 112   ;;  %s1576_s12 = smov 72  }
  0x5a   : > { %1253 = vmatpush3.msra.mxu0 %v245_v2  ;;  %s1577_s13 = smov 104   ;;  %s1578_s25 = smov 56   ;;  %v1005_v2 = vld [vmem:[#allocation9] sm:$0xff] }
  0x5b   : > { %1254 = vmatprep.subr.mxu0 %v1568_v0  ;;  %s1579_s26 = smov 40   ;;  %s1580_s24 = smov 48  }
  0x5c   : > { %1255 = vmatpush3.msra.mxu0 %v244_v3  ;;  %s1581_s27 = smov 8   ;;  %s1582_s28 = smov 16  }
  0x5d   : > { %1256 = vmatprep.subr.mxu0 %v1568_v0  ;;  %s1583_s9 = smov 24   ;;  %p1883_p0 = scmp.ne.s32.totalorder %s1877_s14, 0 }
  0x5e   : > { %1257 = vmatpush3.msra.mxu0 %v243_v4 }
  0x5f   : > { %1259 = vmatmul.mubr.msk.f32.vlgmr.msra.gmra.mxu0 %vm247_vm1, %v242_v5  ;;  %1281 = vmatprep.subr.mxu0 %v1568_v0 }
  0x60   : > { %1283 = vmatprep.mubr.msk.f32.mxu0 %vm1569_vm0, %v1568_v0 }
 0x11f   : > { %v317_v6 = vpop.f32.mrf.mxu0 }
 0x120   : > { %322 = vst.msk [vmem:[#allocation2] sm:$0xff] %vm321_vm2, %v317_v6 }
 0x121   : > { %v1260_v7 = vpop.f32.mrf.mxu0 }
 0x127   : > { %v1755_v8 = vld [vmem:[#allocation2] sm:$0xff] }
 0x128   : > { %413 = vrot.lane.b32.xlu1 %v1755_v8, %s1570_s21  ;;  %326 = vrot.lane.b32.xlu0 %v1755_v8, %s1571_s23  ;;  %v324_v9 = vmul.f32 0.35355338, %v1755_v8  ;;  %s1221_s23 = sshll.u32 %s1631_s19, 7  ;;  %s1584_s19 = smov [#allocation10]  }
 0x12c   : > { %493 = vrot.lane.b32.xlu1 %v1755_v8, %s1572_s29  ;;  %s241_s29 = scalar_lea.vmem [#allocation10], %s1201_s8  ;;  %s1497_s8 = sshll.u32 %s1584_s19, 4  ;;  %s1498_s8 = int_to_ptr.vmem [resolvable:$false] %s1497_s8 }
 0x130   : > { %491 = vrot.lane.b32.xlu1 %v324_v9, %s1573_s5  ;;  %s1104_s5 = sshll.u32 %s241_s29, 4  ;;  %s1105_s5 = int_to_ptr.vmem [resolvable:$true] %s1104_s5 }
 0x131   : > { %p1500_p6 = scmp.lt.s32.totalorder %s1105_s5, %s1498_s8 }
 0x134   : > { %658 = vrot.lane.b32.xlu1 %v1755_v8, %s1574_s6 }
 0x138   : > { %656 = vrot.lane.b32.xlu1 %v324_v9, %s1575_s7 }
 0x13c   : > { %823 = vrot.lane.b32.xlu1 %v1755_v8, %s1576_s12  ;;  %s1825_s12 = scalar_lea.hbm %s1867_s4, %s1221_s23 }
 0x140   : > { %821 = vrot.lane.b32.xlu1 %v324_v9, %s1577_s13  ;;  %s1091_s13 = scalar_lea.sflag [#allocation6], %s1728_s30 }
 0x19a   : > { %v414_v10 = vpop.permute.xlu1 %413  ;;  %v327_v11 = vpop.permute.xlu0 %326 }
 0x19b   : > { %1262 = vmatpush3.xpose.msk.msra.mxu1 %vm328_vm3, %v327_v11 }
 0x19c   : > { %1266 = vmatprep.subr.mxu1 %v1568_v0 }
 0x19e   : > { %v494_v12 = vpop.permute.xlu1 %493  ;;  %1264 = vmatmul.mubr.msk.f32.vlgmr.msra.gmra.mxu1 %vm328_vm3, %v324_v9 }
 0x19f   : > { %1267 = vmatpush3.msra.mxu1 %v414_v10  ;;  %1268 = vmatprep.mubr.msk.f32.mxu1 %vm1569_vm0, %v1568_v0 }
 0x1a0   : > { %1271 = vmatprep.subr.mxu1 %v1568_v0 }
 0x1a2   : > { %v492_v13 = vpop.permute.xlu1 %491 }
 0x1a6   : > { %v659_v14 = vpop.permute.xlu1 %658 }
 0x1a7   : > { %1282 = vmatpush3.xpose.msk.msra.mxu0 %vm328_vm3, %v659_v14 }
 0x1a8   : > { %1291 = vmatprep.subr.mxu0 %v1568_v0 }
 0x1aa   : > { %v657_v15 = vpop.permute.xlu1 %656 }
 0x1ab   : > { %1284 = vmatmul.mubr.msk.f32.vlgmr.msra.gmra.mxu0 %vm328_vm3, %v657_v15 }
 0x1ac   : > { %1293 = vmatprep.mubr.msk.f32.mxu0 %vm1569_vm0, %v1568_v0 }
 0x1ae   : > { %v824_v16 = vpop.permute.xlu1 %823 }
 0x1af   : > { %1292 = vmatpush3.xpose.msk.msra.mxu0 %vm328_vm3, %v824_v16 }
 0x1b0   : > { %1301 = vmatprep.subr.mxu0 %v1568_v0 }
 0x1b2   : > { %v822_v17 = vpop.permute.xlu1 %821 }
 0x1b3   : > { %1294 = vmatmul.mubr.msk.f32.vlgmr.msra.gmra.mxu0 %vm328_vm3, %v822_v17 }
 0x1b4   : > { %1309 = vmatprep.mubr.msk.f32.mxu0 %vm1569_vm0, %v1568_v0  ;;  %1302 = vmatpush3.msra.mxu0 %v1008_v58 }
 0x1b5   : > { %1303 = vmatprep.subr.mxu0 %v1568_v0 }
 0x1b6   : > { %1304 = vmatpush3.msra.mxu0 %v1007_v59 }
 0x1b7   : > { %1305 = vmatprep.subr.mxu0 %v1568_v0 }
 0x1b8   : > { %1306 = vmatpush3.msra.mxu0 %v1006_v63 }
 0x1b9   : > { %1307 = vmatprep.subr.mxu0 %v1568_v0 }
 0x1ba   : > { %1308 = vmatpush3.msra.mxu0 %v1005_v2 }
 0x25e   : > { %v400_v18 = vpop.f32.mrf.mxu1 }
 0x25f   : > { %v404_v19 = vsel %vm328_vm3, %v400_v18, -inf }
 0x260   : > { %405 = vmax.xlane.f32.xlu0 %v404_v19  ;;  %v1265_v20 = vpop.f32.mrf.mxu1 }
 0x261   : > { %v1218_v20 = vld [vmem:[%s1866_s3] ss:$0 sm:$0xff] }
 0x26b   : > { %v730_v21 = vpop.f32.mrf.mxu0 }
 0x26c   : > { %v734_v25 = vsel %vm328_vm3, %v730_v21, -inf }
 0x26d   : > { %v1285_v22 = vpop.f32.mrf.mxu0 }
 0x273   : > { %v895_v23 = vpop.f32.mrf.mxu0 }
 0x274   : > { %v899_v26 = vsel %vm328_vm3, %v895_v23, -inf }
 0x275   : > { %v1295_v24 = vpop.f32.mrf.mxu0 }
 0x276   : > { %578 = vrot.lane.b32.xlu0 %v1755_v8, %s1578_s25  ;;  %s1493_s25 = scalar_lea.vmem %s1105_s5, 128 }
 0x277   : > { %p1494_p11 = scmp.ne.s32.totalorder %s1105_s5, %s1493_s25 }
 0x279   : > { %p1495_p1 = pnand %p1494_p11, %p1883_p0 }
 0x27b   : > { %p1496_p2 = pneg %p1495_p1 }
 0x295   : > { %735 = vmax.xlane.f32.xlu0 %v734_v25 }
 0x299   : > { %900 = vmax.xlane.f32.xlu0 %v899_v26 }
 0x2af   : > { %908 = vrot.lane.b32.xlu0 %v1755_v8, %s1579_s26  ;;  %s1499_s26 = scalar_lea.vmem %s1498_s8, 256 }
 0x2b0   : > { %p1501_p12 = scmp.lt.s32.totalorder %s1499_s26, %s1493_s25 }
 0x2b2   : > { %p1502_p7 = por %p1501_p12, %p1500_p6 }
 0x2b4   : > { %p1503_p9 = pnand %p1502_p7, %p1496_p2 }
 0x2e9   : > { %v406_v27 = vpop.xlane.xlu0 %405 }
 0x2ea   : > { %v407_v28 = vsub.f32 %v400_v18, %v406_v27 }
 0x2ec   : > { %v408_v29 = vmul.f32 1.442695, %v407_v28 }
 0x2ed   : > { %v579_v31 = vpop.permute.xlu0 %578 }
 0x2ee   : > { %1397 = vpow2.f32 %v408_v29 }
 0x2fb   : > { %v1398_v30 = vpop.eup %1397 }
 0x2fc   : > { %1269 = vmatmul.mubr.msk.f32.vlgmr.msra.gmra.mxu1 %vm328_vm3, %v1398_v30  ;;  %v410_v54 = vsel %vm328_vm3, %v1398_v30, 0.0 }
 0x2fd   : > { %1272 = vmatpush3.xpose.msk.msra.mxu1 %vm328_vm3, %v494_v12  ;;  %1273 = vmatprep.mubr.msk.f32.mxu1 %vm1569_vm0, %v1568_v0 }
 0x2fe   : > { %1276 = vmatprep.subr.mxu1 %v1568_v0 }
 0x300   : > { %1274 = vmatmul.mubr.msk.f32.vlgmr.msra.gmra.mxu1 %vm328_vm3, %v492_v13 }
 0x301   : > { %1277 = vmatpush3.msra.mxu1 %v579_v31  ;;  %1278 = vmatprep.mubr.msk.f32.mxu1 %vm1569_vm0, %v1568_v0 }
 0x302   : > { %1286 = vmatprep.subr.mxu1 %v1568_v0 }
 0x31e   : > { %v736_v37 = vpop.xlane.xlu0 %735 }
 0x31f   : > { %v737_v38 = vsub.f32 %v730_v21, %v736_v37 }
 0x321   : > { %v738_v39 = vmul.f32 1.442695, %v737_v38 }
 0x322   : > { %v901_v42 = vpop.xlane.xlu0 %900 }
 0x323   : > { %1399 = vpow2.f32 %v738_v39  ;;  %v902_v43 = vsub.f32 %v895_v23, %v901_v42 }
 0x325   : > { %v903_v46 = vmul.f32 1.442695, %v902_v43 }
 0x326   : > { %v909_v52 = vpop.permute.xlu0 %908 }
 0x330   : > { %v1400_v40 = vpop.eup %1399 }
 0x331   : > { %v740_v41 = vsel %vm328_vm3, %v1400_v40, 0.0 }
 0x3bc   : > { %v1793_v32 = vpop.f32.mrf.mxu1 }
 0x3be   : > { %v1270_v33 = vpop.f32.mrf.mxu1 }
 0x3c0   : > { %v565_v34 = vpop.f32.mrf.mxu1 }
 0x3c1   : > { %v569_v35 = vsel %vm328_vm3, %v565_v34, -inf }
 0x3c2   : > { %570 = vmax.xlane.f32.xlu1 %v569_v35  ;;  %v1275_v36 = vpop.f32.mrf.mxu1 }
 0x3d3   : > { %743 = vrot.lane.b32.xlu1 %v1755_v8, %s1580_s24 }
 0x3f7   : > { %741 = vadd.xlane.f32.xlu1 %v740_v41 }
 0x44b   : > { %v571_v44 = vpop.xlane.xlu1 %570 }
 0x44c   : > { %v572_v45 = vsub.f32 %v565_v34, %v571_v44 }
 0x44e   : > { %v573_v47 = vmul.f32 1.442695, %v572_v45 }
 0x44f   : > { %v744_v49 = vpop.permute.xlu1 %743 }
 0x450   : > { %1401 = vpow2.f32 %v573_v47 }
 0x451   : > { %1403 = vpow2.f32 %v903_v46 }
 0x45d   : > { %v1402_v48 = vpop.eup %1401 }
 0x45e   : > { %1279 = vmatmul.mubr.msk.f32.vlgmr.msra.gmra.mxu1 %vm328_vm3, %v1402_v48  ;;  %v575_v50 = vsel %vm328_vm3, %v1402_v48, 0.0  ;;  %v1404_v51 = vpop.eup %1403 }
 0x45f   : > { %1287 = vmatpush3.msra.mxu1 %v744_v49  ;;  %576 = vadd.xlane.f32.xlu0 %v575_v50  ;;  %v905_v53 = vsel %vm328_vm3, %v1404_v51, 0.0 }
 0x460   : > { %1288 = vmatprep.mubr.msk.f32.mxu1 %vm1569_vm0, %v1568_v0  ;;  %1296 = vmatprep.subr.mxu1 %v1568_v0 }
 0x462   : > { %1289 = vmatmul.mubr.msk.f32.vlgmr.msra.gmra.mxu1 %vm328_vm3, %v1400_v40 }
 0x463   : > { %1297 = vmatpush3.msra.mxu1 %v909_v52  ;;  %906 = vadd.xlane.f32.xlu0 %v905_v53 }
 0x464   : > { %1298 = vmatprep.mubr.msk.f32.mxu1 %vm1569_vm0, %v1568_v0 }
 0x466   : > { %1299 = vmatmul.mubr.msk.f32.vlgmr.msra.gmra.mxu1 %vm328_vm3, %v1404_v51 }
 0x467   : > { %411 = vadd.xlane.f32.xlu0 %v410_v54 }
 0x480   : > { %v742_v56 = vpop.xlane.xlu1 %741 }
 0x4e8   : > { %v577_v55 = vpop.xlane.xlu0 %576 }
 0x4e9   : > { %1405 = vrcp.f32 %v577_v55 }
 0x4ea   : > { %1407 = vrcp.f32 %v742_v56 }
 0x4ec   : > { %v907_v57 = vpop.xlane.xlu0 %906 }
 0x4ed   : > { %1409 = vrcp.f32 %v907_v57 }
 0x4f0   : > { %v412_v11 = vpop.xlane.xlu0 %411 }
 0x4f1   : > { %1411 = vrcp.f32 %v412_v11 }
 0x4f6   : > { %v1406_v60 = vpop.eup %1405 }
 0x4f7   : > { %v1408_v3 = vpop.eup %1407 }
 0x4fa   : > { %v1410_v7 = vpop.eup %1409 }
 0x4fe   : > { %v1412_v12 = vpop.eup %1411 }
 0x4ff   : > { %v490_v14 = vmul.f32 %v1412_v12, %v1793_v32 }
 0x51e   : > { %v650_v61 = vpop.f32.mrf.mxu1 }
 0x51f   : > { %v655_v62 = vmul.f32 %v1406_v60, %v650_v61 }
 0x520   : > { %v1280_v1 = vpop.f32.mrf.mxu1 }
 0x521   : > { %987 = vrot.lane.b32.xlu0 %v655_v62, %s1581_s27 }
 0x522   : > { %v815_v4 = vpop.f32.mrf.mxu1 }
 0x523   : > { %v820_v5 = vmul.f32 %v1408_v3, %v815_v4 }
 0x524   : > { %v1290_v6 = vpop.f32.mrf.mxu1 }
 0x525   : > { %991 = vrot.lane.b32.xlu1 %v820_v5, %s1582_s28 }
 0x526   : > { %v980_v8 = vpop.f32.mrf.mxu1 }
 0x527   : > { %v985_v9 = vmul.f32 %v1410_v7, %v980_v8 }
 0x528   : > { %v1300_v10 = vpop.f32.mrf.mxu1 }
 0x529   : > { %995 = vrot.lane.b32.xlu0 %v985_v9, %s1583_s9 }
 0x593   : > { %v988_v13 = vpop.permute.xlu0 %987 }
 0x594   : > { %v998_v15 = vsel %vm328_vm3, %v490_v14, %v988_v13 }
 0x597   : > { %v992_v0 = vpop.permute.xlu1 %991 }
 0x598   : > { %v1000_v16 = vsel %vm999_vm4, %v998_v15, %v992_v0 }
 0x59b   : > { %v996_v17 = vpop.permute.xlu0 %995 }
 0x59c   : > { %v1002_v18 = vsel %vm1001_vm5, %v1000_v16, %v996_v17 }
 0x59d   : > { %1003 = vst.msk [vmem:[#allocation3] sm:$0xff] %vm247_vm1, %v1002_v18 }
 0x5a4   : > { %v1004_v19 = vld [vmem:[#allocation3] sm:$0xff] }
 0x5a5   : > { %1310 = vmatmul.mubr.msk.f32.vlgmr.msra.gmra.mxu0 %vm247_vm1, %v1004_v19 }
 0x665   : > { %v1085_v21 = vpop.f32.mrf.mxu0 }
 0x666   : > { %v1086_v22 = vadd.f32 %v1218_v20, %v1085_v21 }
 0x667   : > { %v1311_v23 = vpop.f32.mrf.mxu0 }
 0x668   : > { %1089 = vst.msk [vmem:[%s241_s29] sm:$0xff] %vm247_vm1, %v1086_v22 }
 0x669   : > { %1506 = shalt.err (!%p1503_p9)
}
 0x66a   : > { %s1507_s24 = scalar_lea.hbm %s1825_s12, 128  ;;  %s1511_s28 = scalar_lea.hbm %s1867_s4, 256 }
 0x66b   : > { %p1508_p13 = scmp.ne.s32.totalorder %s1825_s12, %s1507_s24  ;;  %p1512_p4 = scmp.lt.s32.totalorder %s1825_s12, %s1867_s4 }
 0x66c   : > { %p1513_p8 = scmp.lt.s32.totalorder %s1511_s28, %s1507_s24 }
 0x66d   : > { %p1509_p5 = pnand %p1508_p13, %p1883_p0 }
 0x66e   : > { %p1514_p3 = por %p1513_p8, %p1512_p4 }
 0x66f   : > { %p1510_p10 = pneg %p1509_p5 }
 0x671   : > { %p1515_p11 = pnand %p1514_p3, %p1510_p10 }
 0x673   : > { %1518 = shalt.err (!%p1515_p11)
}
 0x674   : > { %1322 = dma.vmem_to_hbm [thread:$0]  (%p1883_p0), %s1105_s5, 128, %s1825_s12, %s1091_s13  }
 0x675 PF: > { %s1116_s21 = sand.u32 1, %s1549_s15   ;;  %p1884_p1 = scmp.ne.s32.totalorder %s1873_s22, 0 }
 0x676   : > { %p1885_p2 = scmp.ge.s32.totalorder %s1561_s18, 2  ;;  %s1117_s23 = scalar_lea.sflag [#allocation6], %s1116_s21 }
 0x678   : > { %p1336_p6 = pnand %p1885_p2, %p1884_p1 }
 0x67a   : > { %p1337_p12 = pneg %p1336_p6 }
 0x67c   : > { %1544 = dma.done.wait (%p1337_p12), %s1117_s23, 128  }
 0x67d   : > { %1546 = vsyncadd (%p1337_p12), %s1117_s23, 4294967168  ;;  %p18_p7 = scmp.ge.s32.totalorder %s1682_s11, 4   ;;  %s1886_s15 = smov %s1553_s16 }
 0x67e   : > { %s1887_s16 = smov %s1557_s17  ;;  %s1888_s17 = smov %s1698_s20 }
 0x67f   : > { %s1889_s18 = smov %s1682_s11  ;;  %20 = sbr.rel (!%p18_p7) target bundleno = 6 (0x6), region = 89 }
 0x684   :  { %1122 = vsyncpa [#allocation5], 1 }
 0x685   :  { %1124 = vsyncpa [#allocation5 + $0x1], 1 }
 0x686   :  { %1125 = vsyncpa [#allocation8], 1 }
 0x687   :  { %1126 = vsyncpa [#allocation6], 1 }
 0x688   :  { %1128 = vsyncpa [#allocation6 + $0x1], 1 }

</bundles_post_ra>
